<compile_context>
chip_gen: v6e
topology: v6e:2x2x1
jax: 0.10.0
libtpu: 0.0.40
codegen_flags: <defaults>
</compile_context>

<pallas_src>
import functools

import jax
import jax.numpy as jnp
from jax.experimental import pallas as pl
from jax.experimental.pallas import tpu as pltpu


# ----------------------------------------------------------------------------
# Fused kernel: BN -> Linear_in+tanh -> L x (A^4 @ h -> Linear+tanh) -> Linear_out
# ----------------------------------------------------------------------------
def _sgcn_fused_kernel(x_ref, gamma_ref, beta_ref, adj_ref,
                       wt_in_ref, b_in_ref, wt_sg_ref, b_sg_ref,
                       wt_out_ref, b_out_ref, o_ref,
                       *, num_layers, matmul_dtype):
    # MXU matmul: optionally bf16 operands, always f32 accumulation.
    def mxu(a, b):
        return jnp.dot(a.astype(matmul_dtype), b.astype(matmul_dtype),
                       preferred_element_type=jnp.float32)

    # BatchNorm1d, training-mode batch statistics (biased variance, eps=1e-5).
    # Elementwise math stays in f32 (VPU/EUP).
    x = x_ref[...]                                           # [N, Fp]
    mean = jnp.mean(x, axis=0, keepdims=True)                # [1, Fp]
    var = jnp.mean((x - mean) ** 2, axis=0, keepdims=True)   # biased var (torch BN)
    xbn = (x - mean) * jax.lax.rsqrt(var + 1e-5) * gamma_ref[...] + beta_ref[...]

    # in_conv + tanh (weights pre-transposed, no in-kernel .T).
    h = jnp.tanh(mxu(xbn, wt_in_ref[...]) + b_in_ref[...])   # [N, Hp]

    # Hoist the adjacency power: A^4 computed once, reused by every SGConv layer.
    a = adj_ref[...]                                          # [N, N]
    a2 = mxu(a, a)
    a4 = mxu(a2, a2)

    # SGConv layers: k=4 propagation folded into a single A4 @ h, then Linear+tanh.
    for l in range(num_layers):                               # static unroll
        h = mxu(a4, h)
        h = jnp.tanh(mxu(h, wt_sg_ref[l]) + b_sg_ref[l])

    # out_conv (no activation).  Output last dim is lane-dense (padded to 128).
    o_ref[...] = mxu(h, wt_out_ref[...]) + b_out_ref[...]


# ----------------------------------------------------------------------------
# Host-side one-time parameter prep: transpose + zero-pad to 128 lanes.
# ----------------------------------------------------------------------------
def _round_up(n, m):
    return ((n + m - 1) // m) * m


def _pad_to(a, shape):
    pads = [(0, t - s) for s, t in zip(a.shape, shape)]
    return jnp.pad(a, pads)


def prepare_params(params, lane=128):
    """One-time layout change: Linear weights -> [F_in, F_out], all feature
    dims zero-padded up to a multiple of `lane` so in-kernel stores / MXU
    N-dims are lane-dense.  Zero padding keeps the math exact."""
    f_in = params["w_in"].shape[1]
    hid = params["w_in"].shape[0]
    f_out = params["w_out"].shape[0]
    fp, hp, op = (_round_up(d, lane) for d in (f_in, hid, f_out))

    wt_sg = jnp.stack([w.T for (w, _) in params["sgconv"]])            # [L, H, H]
    b_sg = jnp.stack([b.reshape(1, -1) for (_, b) in params["sgconv"]])  # [L, 1, H]

    return dict(
        f_in=f_in, f_out=f_out, fp=fp, hp=hp, op=op,
        gamma=_pad_to(params["bn_gamma"].reshape(1, -1), (1, fp)),
        beta=_pad_to(params["bn_beta"].reshape(1, -1), (1, fp)),
        wt_in=_pad_to(params["w_in"].T, (fp, hp)),
        b_in=_pad_to(params["b_in"].reshape(1, -1), (1, hp)),
        wt_sg=_pad_to(wt_sg, (wt_sg.shape[0], hp, hp)),
        b_sg=_pad_to(b_sg, (b_sg.shape[0], 1, hp)),
        wt_out=_pad_to(params["w_out"].T, (hp, op)),
        b_out=_pad_to(params["b_out"].reshape(1, -1), (1, op)),
    )


# ----------------------------------------------------------------------------
# Forward: single fused pallas_call, everything resident in VMEM.
# ----------------------------------------------------------------------------
def sgcn_forward(x, adj, pp, matmul_dtype=jnp.bfloat16):
    n = x.shape[0]
    fp, hp, op = pp["fp"], pp["hp"], pp["op"]
    num_layers = int(pp["wt_sg"].shape[0])

    x_pad = _pad_to(x, (n, fp))

    inputs = (x_pad, pp["gamma"], pp["beta"], adj,
              pp["wt_in"], pp["b_in"], pp["wt_sg"], pp["b_sg"],
              pp["wt_out"], pp["b_out"])

    # Whole-array blocks, explicitly pinned to VMEM (everything is < 1 MiB).
    vmem_spec = pl.BlockSpec(memory_space=pltpu.MemorySpace.VMEM)

    flops = 2 * (n * fp * hp                              # in_conv
                 + 2 * n * n * n                          # A2, A4 (hoisted)
                 + num_layers * (n * n * hp + n * hp * hp)  # per SGConv layer
                 + n * hp * op)                           # out_conv
    transcendentals = n * hp * (1 + num_layers)           # tanh
    bytes_accessed = (sum(int(a.size) * int(a.dtype.itemsize) for a in inputs)
                      + n * op * 4)

    out_pad = pl.pallas_call(
        functools.partial(_sgcn_fused_kernel,
                          num_layers=num_layers, matmul_dtype=matmul_dtype),
        out_shape=jax.ShapeDtypeStruct((n, op), jnp.float32),
        in_specs=[vmem_spec] * len(inputs),
        out_specs=vmem_spec,
        compiler_params=pltpu.CompilerParams(vmem_limit_bytes=8 * 1024 * 1024),
        cost_estimate=pl.CostEstimate(flops=int(flops),
                                      transcendentals=int(transcendentals),
                                      bytes_accessed=int(bytes_accessed)),
    )(*inputs)

    # Padded output columns are exactly zero; slice back to true out_features.
    return out_pad[:, :pp["f_out"]]


# ----------------------------------------------------------------------------
# Pure-JAX f32 reference (sanity check only)
# ----------------------------------------------------------------------------
def sgcn_reference(x, adj, params):
    mean = jnp.mean(x, axis=0, keepdims=True)
    var = jnp.mean((x - mean) ** 2, axis=0, keepdims=True)
    h = (x - mean) / jnp.sqrt(var + 1e-5) * params["bn_gamma"] + params["bn_beta"]
    h = jnp.tanh(h @ params["w_in"].T + params["b_in"])
    for (w, b) in params["sgconv"]:
        for _ in range(4):
            h = adj @ h
        h = jnp.tanh(h @ w.T + b)
    return h @ params["w_out"].T + params["b_out"]


if __name__ == "__main__":
    # Small, module-consistent shapes:
    #   N nodes = 64, in_features = 16, hidden_features = [32, 32], out = 8
    N, F_IN, H, F_OUT = 64, 16, 32, 8

    key = jax.random.PRNGKey(0)
    k_x, k_a, k_wi, k_bi, k_ws, k_bs, k_wo, k_bo = jax.random.split(key, 8)

    x = jax.random.normal(k_x, (N, F_IN), dtype=jnp.float32)

    # Dense, row-normalized random adjacency (stand-in for torch.spmm's sparse adj).
    a_raw = (jax.random.uniform(k_a, (N, N)) < 0.1).astype(jnp.float32)
    a_raw = a_raw + jnp.eye(N, dtype=jnp.float32)            # self loops
    adj = a_raw / jnp.sum(a_raw, axis=1, keepdims=True)      # row-normalize

    def lin_init(kw, kb, fan_out, fan_in):
        bound = 1.0 / jnp.sqrt(jnp.float32(fan_in))
        w = jax.random.uniform(kw, (fan_out, fan_in), minval=-bound, maxval=bound,
                               dtype=jnp.float32)
        b = jax.random.uniform(kb, (fan_out,), minval=-bound, maxval=bound,
                               dtype=jnp.float32)
        return w, b

    w_in, b_in = lin_init(k_wi, k_bi, H, F_IN)        # in_conv: Linear(F_IN, H)
    w_sg, b_sg = lin_init(k_ws, k_bs, H, H)           # SGConv.linear: Linear(H, H)
    w_out, b_out = lin_init(k_wo, k_bo, F_OUT, H)     # out_conv: Linear(H, F_OUT)

    params = {
        "bn_gamma": jnp.ones((F_IN,), jnp.float32),   # BatchNorm1d affine init
        "bn_beta": jnp.zeros((F_IN,), jnp.float32),
        "w_in": w_in, "b_in": b_in,
        "sgconv": [(w_sg, b_sg)],                     # hidden_features=[32,32] -> 1 SGConv
        "w_out": w_out, "b_out": b_out,
    }

    # One-time weight transpose + lane padding (hoisted out of the per-call path).
    pp = prepare_params(params)

    # f32 MXU path (tight validation) and bf16-operand MXU path (v5e/v6e/v7x perf).
    out_f32 = sgcn_forward(x, adj, pp, matmul_dtype=jnp.float32)
    out_bf16 = sgcn_forward(x, adj, pp, matmul_dtype=jnp.bfloat16)
    jax.block_until_ready((out_f32, out_bf16))

    ref = sgcn_reference(x, adj, params)
    assert out_f32.shape == (N, F_OUT)
    assert out_bf16.shape == (N, F_OUT)
    assert jnp.allclose(out_f32, ref, atol=1e-4, rtol=1e-4), "f32 kernel mismatch"
    assert jnp.allclose(out_bf16, ref, atol=5e-2, rtol=5e-2), "bf16 kernel mismatch"

    print("KERNEL_OK")
</pallas_src>

<mosaic_0001>
module attributes {stable_mosaic.version = 11 : i64} {
  func.func @_sgcn_fused_kernel(%arg0: memref<64x128xf32, #tpu.memory_space<vmem>>, %arg1: memref<1x128xf32, #tpu.memory_space<vmem>>, %arg2: memref<1x128xf32, #tpu.memory_space<vmem>>, %arg3: memref<64x64xf32, #tpu.memory_space<vmem>>, %arg4: memref<128x128xf32, #tpu.memory_space<vmem>>, %arg5: memref<1x128xf32, #tpu.memory_space<vmem>>, %arg6: memref<1x128x128xf32, #tpu.memory_space<vmem>>, %arg7: memref<1x1x128xf32, #tpu.memory_space<vmem>>, %arg8: memref<128x128xf32, #tpu.memory_space<vmem>>, %arg9: memref<1x128xf32, #tpu.memory_space<vmem>>, %arg10: memref<64x128xf32, #tpu.memory_space<vmem>>) attributes {dimension_semantics = [], scalar_prefetch = 0 : i64, scratch_operands = 0 : i64, tpu.core_type = #tpu.core_type<tc>} {
    %c0 = arith.constant 0 : index
    %c0_0 = arith.constant 0 : index
    %0 = vector.load %arg0[%c0, %c0_0] : memref<64x128xf32, #tpu.memory_space<vmem>>, vector<64x128xf32>
    %cst = arith.constant dense<0.000000e+00> : vector<128xf32>
    %1 = vector.multi_reduction <add>, %0, %cst [0] : vector<64x128xf32> to vector<128xf32>
    %2 = vector.shape_cast %1 : vector<128xf32> to vector<1x128xf32>
    %cst_1 = arith.constant 6.400000e+01 : f32
    %3 = vector.broadcast %cst_1 : f32 to vector<1x128xf32>
    %4 = arith.divf %2, %3 : vector<1x128xf32>
    %5 = vector.broadcast %4 : vector<1x128xf32> to vector<64x128xf32>
    %6 = arith.subf %0, %5 : vector<64x128xf32>
    %7 = arith.mulf %6, %6 : vector<64x128xf32>
    %cst_2 = arith.constant dense<0.000000e+00> : vector<128xf32>
    %8 = vector.multi_reduction <add>, %7, %cst_2 [0] : vector<64x128xf32> to vector<128xf32>
    %9 = vector.shape_cast %8 : vector<128xf32> to vector<1x128xf32>
    %cst_3 = arith.constant 6.400000e+01 : f32
    %10 = vector.broadcast %cst_3 : f32 to vector<1x128xf32>
    %11 = arith.divf %9, %10 : vector<1x128xf32>
    %12 = vector.broadcast %4 : vector<1x128xf32> to vector<64x128xf32>
    %13 = arith.subf %0, %12 : vector<64x128xf32>
    %cst_4 = arith.constant 9.99999974E-6 : f32
    %14 = vector.broadcast %cst_4 : f32 to vector<1x128xf32>
    %15 = arith.addf %11, %14 : vector<1x128xf32>
    %16 = math.rsqrt %15 : vector<1x128xf32>
    %17 = vector.broadcast %16 : vector<1x128xf32> to vector<64x128xf32>
    %18 = arith.mulf %13, %17 : vector<64x128xf32>
    %c0_5 = arith.constant 0 : index
    %c0_6 = arith.constant 0 : index
    %19 = vector.load %arg1[%c0_5, %c0_6] : memref<1x128xf32, #tpu.memory_space<vmem>>, vector<1x128xf32>
    %20 = vector.broadcast %19 : vector<1x128xf32> to vector<64x128xf32>
    %21 = arith.mulf %18, %20 : vector<64x128xf32>
    %c0_7 = arith.constant 0 : index
    %c0_8 = arith.constant 0 : index
    %22 = vector.load %arg2[%c0_7, %c0_8] : memref<1x128xf32, #tpu.memory_space<vmem>>, vector<1x128xf32>
    %23 = vector.broadcast %22 : vector<1x128xf32> to vector<64x128xf32>
    %24 = arith.addf %21, %23 : vector<64x128xf32>
    %c0_9 = arith.constant 0 : index
    %c0_10 = arith.constant 0 : index
    %25 = vector.load %arg4[%c0_9, %c0_10] : memref<128x128xf32, #tpu.memory_space<vmem>>, vector<128x128xf32>
    %cst_11 = arith.constant dense<0.000000e+00> : vector<64x128xf32>
    %26 = tpu.matmul %24, %25, %cst_11 {dimension_numbers = #tpu.dot_dimension_numbers<[1], [0], [0], [1], [0, 0, 1, 1], [], []>} : vector<64x128xf32>, vector<128x128xf32>, vector<64x128xf32> -> vector<64x128xf32>
    %c0_12 = arith.constant 0 : index
    %c0_13 = arith.constant 0 : index
    %27 = vector.load %arg5[%c0_12, %c0_13] : memref<1x128xf32, #tpu.memory_space<vmem>>, vector<1x128xf32>
    %28 = vector.broadcast %27 : vector<1x128xf32> to vector<64x128xf32>
    %29 = arith.addf %26, %28 : vector<64x128xf32>
    %30 = math.tanh %29 : vector<64x128xf32>
    %c0_14 = arith.constant 0 : index
    %c0_15 = arith.constant 0 : index
    %31 = vector.load %arg3[%c0_14, %c0_15] : memref<64x64xf32, #tpu.memory_space<vmem>>, vector<64x64xf32>
    %cst_16 = arith.constant dense<0.000000e+00> : vector<64x64xf32>
    %32 = tpu.matmul %31, %31, %cst_16 {dimension_numbers = #tpu.dot_dimension_numbers<[1], [0], [0], [1], [0, 0, 1, 1], [], []>} : vector<64x64xf32>, vector<64x64xf32>, vector<64x64xf32> -> vector<64x64xf32>
    %cst_17 = arith.constant dense<0.000000e+00> : vector<64x64xf32>
    %33 = tpu.matmul %32, %32, %cst_17 {dimension_numbers = #tpu.dot_dimension_numbers<[1], [0], [0], [1], [0, 0, 1, 1], [], []>} : vector<64x64xf32>, vector<64x64xf32>, vector<64x64xf32> -> vector<64x64xf32>
    %cst_18 = arith.constant dense<0.000000e+00> : vector<64x128xf32>
    %34 = tpu.matmul %33, %30, %cst_18 {dimension_numbers = #tpu.dot_dimension_numbers<[1], [0], [0], [1], [0, 0, 1, 1], [], []>} : vector<64x64xf32>, vector<64x128xf32>, vector<64x128xf32> -> vector<64x128xf32>
    %c0_19 = arith.constant 0 : index
    %c0_20 = arith.constant 0 : index
    %c0_21 = arith.constant 0 : index
    %35 = vector.load %arg6[%c0_19, %c0_20, %c0_21] : memref<1x128x128xf32, #tpu.memory_space<vmem>>, vector<1x128x128xf32>
    %36 = vector.shape_cast %35 : vector<1x128x128xf32> to vector<128x128xf32>
    %cst_22 = arith.constant dense<0.000000e+00> : vector<64x128xf32>
    %37 = tpu.matmul %34, %36, %cst_22 {dimension_numbers = #tpu.dot_dimension_numbers<[1], [0], [0], [1], [0, 0, 1, 1], [], []>} : vector<64x128xf32>, vector<128x128xf32>, vector<64x128xf32> -> vector<64x128xf32>
    %c0_23 = arith.constant 0 : index
    %c0_24 = arith.constant 0 : index
    %c0_25 = arith.constant 0 : index
    %38 = vector.load %arg7[%c0_23, %c0_24, %c0_25] : memref<1x1x128xf32, #tpu.memory_space<vmem>>, vector<1x1x128xf32>
    %39 = vector.shape_cast %38 : vector<1x1x128xf32> to vector<1x128xf32>
    %40 = vector.broadcast %39 : vector<1x128xf32> to vector<64x128xf32>
    %41 = arith.addf %37, %40 : vector<64x128xf32>
    %42 = math.tanh %41 : vector<64x128xf32>
    %c0_26 = arith.constant 0 : index
    %c0_27 = arith.constant 0 : index
    %43 = vector.load %arg8[%c0_26, %c0_27] : memref<128x128xf32, #tpu.memory_space<vmem>>, vector<128x128xf32>
    %cst_28 = arith.constant dense<0.000000e+00> : vector<64x128xf32>
    %44 = tpu.matmul %42, %43, %cst_28 {dimension_numbers = #tpu.dot_dimension_numbers<[1], [0], [0], [1], [0, 0, 1, 1], [], []>} : vector<64x128xf32>, vector<128x128xf32>, vector<64x128xf32> -> vector<64x128xf32>
    %c0_29 = arith.constant 0 : index
    %c0_30 = arith.constant 0 : index
    %45 = vector.load %arg9[%c0_29, %c0_30] : memref<1x128xf32, #tpu.memory_space<vmem>>, vector<1x128xf32>
    %46 = vector.broadcast %45 : vector<1x128xf32> to vector<64x128xf32>
    %47 = arith.addf %44, %46 : vector<64x128xf32>
    %c0_31 = arith.constant 0 : index
    %c0_32 = arith.constant 0 : index
    %48 = vector.load %arg10[%c0_31, %c0_32] : memref<64x128xf32, #tpu.memory_space<vmem>>, vector<64x128xf32>
    tpu.vector_store %arg10[%c0_31, %c0_32], %47 {strides = array<i32>} : memref<64x128xf32, #tpu.memory_space<vmem>>, vector<64x128xf32>,
    return
  }
}

</mosaic_0001>

<bundles_post_ra>
// kernel: tpu_custom_call.1
= control target key start
LH: loop header
LB: loop body
LE: loop exit
PB: predicated region body
PF: predicated region fallthrough
CT: control target
= control target key end

     0   :  { %15 = vsyncpa [#allocation3], 0  ;;  %s1728_s0 = inlined_call_operand.hbm [shape: f32[64,128], index: 0, kind: input, shape index: {}]   ;;  %s1729_s1 = inlined_call_operand.vmem [shape: f32[1,128], index: 1, kind: input, shape index: {}]   ;;  %s1730_s2 = inlined_call_operand.vmem [shape: f32[1,128], index: 2, kind: input, shape index: {}]   ;;  %s1731_s3 = inlined_call_operand.hbm [shape: f32[64,64], index: 3, kind: input, shape index: {}]   ;;  %s1732_s4 = inlined_call_operand.hbm [shape: f32[128,128], index: 4, kind: input, shape index: {}]   ;;  %s1733_s5 = inlined_call_operand.vmem [shape: f32[1,128], index: 5, kind: input, shape index: {}]   ;;  %s1734_s6 = inlined_call_operand.hbm [shape: f32[1,128,128], index: 6, kind: input, shape index: {}]   ;;  %s1735_s7 = inlined_call_operand.vmem [shape: f32[1,1,128], index: 7, kind: input, shape index: {}]   ;;  %s1736_s8 = inlined_call_operand.hbm [shape: f32[128,128], index: 8, kind: input, shape index: {}]   ;;  %s1737_s9 = inlined_call_operand.vmem [shape: f32[1,128], index: 9, kind: input, shape index: {}]   ;;  %s1738_s10 = inlined_call_operand.hbm [shape: f32[64,128], index: 10, kind: output, shape index: {}]  }
   0x1   :  { %16 = vsyncpa [#allocation6], 0 }
   0x2   :  { %17 = vsyncpa [#allocation9], 0 }
   0x3   :  { %18 = vsyncpa [#allocation4], 0  ;;  %s1555_s13 = smov [#allocation5]   ;;  %s1556_s15 = smov [#allocation8]  }
   0x4   :  { %s40_s14 = sshll.u32 %s1555_s13, 4  ;;  %s66_s16 = sshll.u32 %s1556_s15, 4  ;;  %s41_s14 = int_to_ptr.vmem [resolvable:$true] %s40_s14  ;;  %s67_s16 = int_to_ptr.vmem [resolvable:$true] %s66_s16 }
   0x5   :  { %s1435_s17 = scalar_lea.vmem %s41_s14, 1024  ;;  %p1440_p1 = scmp.lt.s32.totalorder %s41_s14, %s41_s14 }
   0x6   :  { %p1436_p0 = scmp.ne.s32.totalorder %s41_s14, %s1435_s17  ;;  %p1441_p2 = scmp.lt.s32.totalorder %s1435_s17, %s1435_s17 }
   0x8   :  { %p1442_p3 = por %p1441_p2, %p1440_p1 }
   0xa   :  { %p1443_p4 = pnand %p1442_p3, %p1436_p0 }
   0xc   :  { %1446 = shalt.err (!%p1443_p4)
}
   0xd   :  { %s1557_s18 = smov 128   ;;  %s1558_s19 = smov 8  }
   0xe   :  { %46 = dma.hbm_to_vmem [thread:$0]  %s1731_s3, 1024, %s41_s14, [#allocation6], %s1557_s18, %s1557_s18, %s1558_s19  }
   0xf   :  { %s1455_s22 = scalar_lea.vmem %s67_s16, 2048  ;;  %p1460_p6 = scmp.lt.s32.totalorder %s67_s16, %s67_s16 }
  0x10   :  { %p1456_p5 = scmp.ne.s32.totalorder %s67_s16, %s1455_s22  ;;  %p1461_p7 = scmp.lt.s32.totalorder %s1455_s22, %s1455_s22 }
  0x12   :  { %p1462_p8 = por %p1461_p7, %p1460_p6 }
  0x14   :  { %p1463_p9 = pnand %p1462_p8, %p1456_p5 }
  0x16   :  { %1466 = shalt.err (!%p1463_p9)
}
  0x17   :  { %72 = dma.hbm_to_vmem [thread:$0]  %s1734_s6, 2048, %s67_s16, [#allocation9], %s1557_s18, %s1557_s18, %s1558_s19  }
  0x18   :  { %s1559_s25 = smov [#allocation2]   ;;  %s1560_s27 = smov [#allocation7]  }
  0x19   :  { %s24_s26 = sshll.u32 %s1559_s25, 4  ;;  %s52_s28 = sshll.u32 %s1560_s27, 4  ;;  %s25_s26 = int_to_ptr.vmem [resolvable:$true] %s24_s26  ;;  %s53_s28 = int_to_ptr.vmem [resolvable:$true] %s52_s28 }
  0x1a   :  { %s1475_s3 = scalar_lea.vmem %s25_s26, 1024  ;;  %p1480_p11 = scmp.lt.s32.totalorder %s25_s26, %s25_s26 }
  0x1b   :  { %p1476_p10 = scmp.ne.s32.totalorder %s25_s26, %s1475_s3  ;;  %p1481_p12 = scmp.lt.s32.totalorder %s1475_s3, %s1475_s3 }
  0x1d   :  { %p1482_p13 = por %p1481_p12, %p1480_p11 }
  0x1f   :  { %p1483_p0 = pnand %p1482_p13, %p1476_p10 }
  0x21   :  { %1486 = shalt.err (!%p1483_p0)
}
  0x22   :  { %30 = dma.hbm_to_vmem [thread:$0]  %s1728_s0, 1024, %s25_s26, [#allocation3], %s1557_s18, %s1557_s18, %s1558_s19  }
  0x23   :  { %s1495_s6 = scalar_lea.vmem %s53_s28, 2048  ;;  %p1500_p2 = scmp.lt.s32.totalorder %s53_s28, %s53_s28 }
  0x24   :  { %p1496_p1 = scmp.ne.s32.totalorder %s53_s28, %s1495_s6  ;;  %p1501_p3 = scmp.lt.s32.totalorder %s1495_s6, %s1495_s6 }
  0x26   :  { %p1502_p4 = por %p1501_p3, %p1500_p2 }
  0x28   :  { %p1503_p5 = pnand %p1502_p4, %p1496_p1 }
  0x2a   :  { %1506 = shalt.err (!%p1503_p5)
}
  0x2b   :  { %58 = dma.hbm_to_vmem [thread:$0]  %s1732_s4, 2048, %s53_s28, [#allocation6], %s1557_s18, %s1557_s18, %s1558_s19  }
  0x2c   :  { %s1561_s13 = smov [#allocation10]  }
  0x2d   :  { %s80_s14 = sshll.u32 %s1561_s13, 4  ;;  %s81_s14 = int_to_ptr.vmem [resolvable:$true] %s80_s14 }
  0x2e   :  { %s1515_s15 = scalar_lea.vmem %s81_s14, 2048  ;;  %p1520_p7 = scmp.lt.s32.totalorder %s81_s14, %s81_s14 }
  0x2f   :  { %p1516_p6 = scmp.ne.s32.totalorder %s81_s14, %s1515_s15  ;;  %p1521_p8 = scmp.lt.s32.totalorder %s1515_s15, %s1515_s15 }
  0x31   :  { %p1522_p9 = por %p1521_p8, %p1520_p7 }
  0x33   :  { %p1523_p10 = pnand %p1522_p9, %p1516_p6 }
  0x35   :  { %1526 = shalt.err (!%p1523_p10)
}
  0x36   :  { %86 = dma.hbm_to_vmem [thread:$0]  %s1736_s8, 2048, %s81_s14, [#allocation9], %s1557_s18, %s1557_s18, %s1558_s19  }
  0x37   :  { %1547 = dma.done.wait [#allocation3], 1024  }
  0x38   :  { %1548 = vsyncadd [#allocation3], 4294966272 }
  0x39   :  { %1549 = dma.done.wait [#allocation6], 3072  }
  0x3a   :  { %1550 = vsyncadd [#allocation6], 4294964224 }
  0x3b   :  { %1551 = dma.done.wait [#allocation9], 4096  }
  0x3c   :  { %1552 = vsyncadd [#allocation9], 4294963200  ;;  %v1648_v0 = vld [vmem:[#allocation5 + $0x38] sm:$0xff]  ;;  %v1650_v1 = vld [vmem:[#allocation5 + $0x30] sm:$0xff]  ;;  %vm341_vm0 = vcmask 523264   ;;  %s1562_s23 = smov [#allocation11]  }
  0x3d   :  { %1213 = vmatprep.subr.mxu1 %v1648_v0  ;;  %v1654_v2 = vld [vmem:[#allocation5 + $0x28] sm:$0xff]  ;;  %v333_v3 = vld [vmem:[#allocation5] sm:$0xff]  ;;  %v212_v4 = vld [vmem:[#allocation7 + $0x78] sm:$0xff] }
  0x3e   :  { %1214 = vmatpush3.msra.mxu1 %v1648_v0  ;;  %1229 = vmatprep.mubr.msk.f32.mxu1 %vm341_vm0, %v333_v3  ;;  %v211_v5 = vld [vmem:[#allocation7 + $0x70] sm:$0xff]  ;;  %v337_v6 = vld [vmem:[#allocation5 + $0x20] sm:$0xff]  ;;  %v210_v7 = vld [vmem:[#allocation7 + $0x68] sm:$0xff] }
  0x3f   :  { %1215 = vmatprep.subr.mxu1 %v1650_v1  ;;  %1169 = vmatprep.subr.mxu0 %v212_v4  ;;  %v336_v8 = vld [vmem:[#allocation5 + $0x18] sm:$0xff]  ;;  %v335_v9 = vld [vmem:[#allocation5 + $0x10] sm:$0xff]  ;;  %v209_v10 = vld [vmem:[#allocation7 + $0x60] sm:$0xff] }
  0x40   :  { %1216 = vmatpush3.msra.mxu1 %v1650_v1  ;;  %1170 = vmatpush3.msra.mxu0 %v212_v4  ;;  %v1661_v11 = vld [vmem:[#allocation2] sm:$0xff]  ;;  %v1663_v12 = vld [vmem:[#allocation2 + $0x8] sm:$0xff]  ;;  %v1665_v13 = vld [vmem:[#allocation2 + $0x10] sm:$0xff] }
  0x41   :  { %1217 = vmatprep.subr.mxu1 %v1654_v2  ;;  %1171 = vmatprep.subr.mxu0 %v211_v5  ;;  %v208_v14 = vld [vmem:[#allocation7 + $0x58] sm:$0xff]  ;;  %v112_v15 = vadd.f32 %v1663_v12, %v1661_v11  ;;  %v334_v16 = vld [vmem:[#allocation5 + $0x8] sm:$0xff]  ;;  %v207_v18 = vld [vmem:[#allocation7 + $0x50] sm:$0xff] }
  0x42   :  { %1218 = vmatpush3.msra.mxu1 %v1654_v2  ;;  %1172 = vmatpush3.msra.mxu0 %v211_v5  ;;  %v1669_v17 = vld [vmem:[#allocation2 + $0x18] sm:$0xff]  ;;  %v1672_v20 = vld [vmem:[#allocation2 + $0x20] sm:$0xff]  ;;  %v206_v21 = vld [vmem:[#allocation7 + $0x48] sm:$0xff] }
  0x43   :  { %1219 = vmatprep.subr.mxu1 %v337_v6  ;;  %1173 = vmatprep.subr.mxu0 %v210_v7  ;;  %v113_v19 = vadd.f32 %v112_v15, %v1665_v13  ;;  %v109_v23 = vld [vmem:[#allocation2 + $0x28] sm:$0xff]  ;;  %v205_v24 = vld [vmem:[#allocation7 + $0x40] sm:$0xff]  ;;  %v110_v26 = vld [vmem:[#allocation2 + $0x30] sm:$0xff] }
  0x44   :  { %1220 = vmatpush3.msra.mxu1 %v337_v6  ;;  %1174 = vmatpush3.msra.mxu0 %v210_v7  ;;  %v204_v27 = vld [vmem:[#allocation7 + $0x38] sm:$0xff]  ;;  %v203_v30 = vld [vmem:[#allocation7 + $0x30] sm:$0xff]  ;;  %v202_v32 = vld [vmem:[#allocation7 + $0x28] sm:$0xff] }
  0x45   :  { %1221 = vmatprep.subr.mxu1 %v336_v8  ;;  %1175 = vmatprep.subr.mxu0 %v209_v10  ;;  %v114_v22 = vadd.f32 %v113_v19, %v1669_v17  ;;  %v111_v29 = vld [vmem:[#allocation2 + $0x38] sm:$0xff]  ;;  %v201_v34 = vld [vmem:[#allocation7 + $0x20] sm:$0xff]  ;;  %v199_v38 = vld [vmem:[#allocation7 + $0x10] sm:$0xff] }
  0x46   :  { %1222 = vmatpush3.msra.mxu1 %v336_v8  ;;  %1176 = vmatpush3.msra.mxu0 %v209_v10  ;;  %v200_v36 = vld [vmem:[#allocation7 + $0x18] sm:$0xff]  ;;  %v198_v40 = vld [vmem:[#allocation7 + $0x8] sm:$0xff]  ;;  %v197_v42 = vld [vmem:[#allocation7] sm:$0xff] }
  0x47   :  { %1223 = vmatprep.subr.mxu1 %v335_v9  ;;  %1177 = vmatprep.subr.mxu0 %v208_v14  ;;  %v115_v25 = vadd.f32 %v114_v22, %v1672_v20  ;;  %v1021_v19 = vld [vmem:[%s1730_s2] ss:$0 sm:$0xff] }
  0x48   :  { %1224 = vmatpush3.msra.mxu1 %v335_v9  ;;  %1178 = vmatpush3.msra.mxu0 %v208_v14  ;;  %v1020_v14 = vld [vmem:[%s1729_s1] ss:$0 sm:$0xff] }
  0x49   :  { %1225 = vmatprep.subr.mxu1 %v334_v16  ;;  %1179 = vmatprep.subr.mxu0 %v207_v18  ;;  %v116_v28 = vadd.f32 %v115_v25, %v109_v23 }
  0x4a   :  { %1226 = vmatpush3.msra.mxu1 %v334_v16  ;;  %1180 = vmatpush3.msra.mxu0 %v207_v18 }
  0x4b   :  { %1227 = vmatprep.subr.mxu1 %v333_v3  ;;  %1181 = vmatprep.subr.mxu0 %v206_v21  ;;  %v117_v31 = vadd.f32 %v116_v28, %v110_v26 }
  0x4c   :  { %1228 = vmatpush3.msra.mxu1 %v333_v3  ;;  %1182 = vmatpush3.msra.mxu0 %v206_v21 }
  0x4d   :  { %1230 = vmatmul.mubr.msk.f32.vlgmr.msra.gmra.mxu1 %vm341_vm0, %v334_v16  ;;  %1183 = vmatprep.subr.mxu0 %v205_v24  ;;  %v118_v33 = vadd.f32 %v117_v31, %v111_v29 }
  0x4e   :  { %1232 = vmatprep.mubr.msk.f32.mxu1 %vm341_vm0, %v335_v9  ;;  %1184 = vmatpush3.msra.mxu0 %v205_v24 }
  0x4f   :  { %1185 = vmatprep.subr.mxu0 %v204_v27  ;;  %v119_v35 = vrot.slane %v118_v33, 4 }
  0x50   :  { %1186 = vmatpush3.msra.mxu0 %v204_v27 }
  0x51   :  { %1233 = vmatmul.mubr.msk.f32.gmra.mxu1 %vm341_vm0, %v336_v8  ;;  %1187 = vmatprep.subr.mxu0 %v203_v30  ;;  %v120_v37 = vadd.f32 %v119_v35, %v118_v33 }
  0x52   :  { %1235 = vmatprep.mubr.msk.f32.mxu1 %vm341_vm0, %v337_v6  ;;  %1188 = vmatpush3.msra.mxu0 %v203_v30 }
  0x53   :  { %1189 = vmatprep.subr.mxu0 %v202_v32  ;;  %v121_v39 = vrot.slane %v120_v37, 2 }
  0x54   :  { %1190 = vmatpush3.msra.mxu0 %v202_v32 }
  0x55   :  { %1236 = vmatmul.mubr.msk.f32.gmra.mxu1 %vm341_vm0, %v1654_v2  ;;  %1191 = vmatprep.subr.mxu0 %v201_v34  ;;  %v122_v41 = vadd.f32 %v121_v39, %v120_v37 }
  0x56   :  { %1238 = vmatprep.mubr.msk.f32.mxu1 %vm341_vm0, %v1650_v1  ;;  %1192 = vmatpush3.msra.mxu0 %v201_v34 }
  0x57   :  { %1193 = vmatprep.subr.mxu0 %v200_v36  ;;  %v123_v43 = vrot.slane %v122_v41, 1 }
  0x58   :  { %1194 = vmatpush3.msra.mxu0 %v200_v36 }
  0x59   :  { %1239 = vmatmul.mubr.msk.f32.gmra.mxu1 %vm341_vm0, %v1648_v0  ;;  %1195 = vmatprep.subr.mxu0 %v199_v38  ;;  %v124_v44 = vadd.f32 %v123_v43, %v122_v41 }
  0x5a   :  { %1196 = vmatpush3.msra.mxu0 %v199_v38 }
  0x5b   :  { %1197 = vmatprep.subr.mxu0 %v198_v40  ;;  %v126_v45 = vmul.f32 0.015625, %v124_v44 }
  0x5c   :  { %1198 = vmatpush3.msra.mxu0 %v198_v40 }
  0x5d   :  { %1199 = vmatprep.subr.mxu0 %v197_v42  ;;  %v127_v46 = vsub.f32 %v1661_v11, %v126_v45  ;;  %v128_v47 = vsub.f32 %v1663_v12, %v126_v45  ;;  %v129_v48 = vsub.f32 %v1665_v13, %v126_v45  ;;  %v130_v49 = vsub.f32 %v1669_v17, %v126_v45 }
  0x5e   :  { %1200 = vmatpush3.msra.mxu0 %v197_v42  ;;  %v131_v50 = vsub.f32 %v1672_v20, %v126_v45  ;;  %v132_v54 = vsub.f32 %v109_v23, %v126_v45  ;;  %v133_v57 = vsub.f32 %v110_v26, %v126_v45  ;;  %v134_v60 = vsub.f32 %v111_v29, %v126_v45 }
  0x5f   :  { %v135_v51 = vmul.f32 %v127_v46, %v127_v46  ;;  %v136_v52 = vmul.f32 %v128_v47, %v128_v47  ;;  %v137_v53 = vmul.f32 %v129_v48, %v129_v48  ;;  %v138_v55 = vmul.f32 %v130_v49, %v130_v49 }
  0x60   :  { %v139_v58 = vmul.f32 %v131_v50, %v131_v50  ;;  %v140_v61 = vmul.f32 %v132_v54, %v132_v54  ;;  %v141_v63 = vmul.f32 %v133_v57, %v133_v57  ;;  %v142_v1 = vmul.f32 %v134_v60, %v134_v60 }
  0x61   :  { %v143_v56 = vadd.f32 %v136_v52, %v135_v51 }
  0x63   :  { %v144_v59 = vadd.f32 %v143_v56, %v137_v53  ;;  %v1022_v53 = vld [vmem:[%s1733_s5] ss:$0 sm:$0xff] }
  0x65   :  { %v145_v62 = vadd.f32 %v144_v59, %v138_v55 }
  0x67   :  { %v146_v0 = vadd.f32 %v145_v62, %v139_v58 }
  0x69   :  { %v147_v2 = vadd.f32 %v146_v0, %v140_v61 }
  0x6b   :  { %v148_v3 = vadd.f32 %v147_v2, %v141_v63 }
  0x6d   :  { %v149_v4 = vadd.f32 %v148_v3, %v142_v1 }
  0x6f   :  { %v150_v5 = vrot.slane %v149_v4, 4 }
  0x71   :  { %v151_v6 = vadd.f32 %v150_v5, %v149_v4 }
  0x73   :  { %v152_v7 = vrot.slane %v151_v6, 2 }
  0x75   :  { %v153_v8 = vadd.f32 %v152_v7, %v151_v6  ;;  %v744_v6 = vld [vmem:[#allocation8 + $0x78] sm:$0xff]  ;;  %v743_v7 = vld [vmem:[#allocation8 + $0x70] sm:$0xff] }
  0x77   :  { %v154_v9 = vrot.slane %v153_v8, 1 }
  0x79   :  { %v155_v10 = vadd.f32 %v154_v9, %v153_v8  ;;  %v742_v9 = vld [vmem:[#allocation8 + $0x68] sm:$0xff] }
  0x7b   :  { %v156_v11 = vmul.f32 0.015625, %v155_v10 }
  0x7d   :  { %v157_v12 = vadd.f32 1e-05, %v156_v11  ;;  %v741_v11 = vld [vmem:[#allocation8 + $0x60] sm:$0xff] }
  0x7f   :  { %1393 = vrsqrt.f32 %v157_v12 }
  0x8c   :  { %v1394_v13 = vpop.eup %1393 }
  0x8d   :  { %v159_v15 = vmul.f32 %v1394_v13, %v127_v46  ;;  %v160_v16 = vmul.f32 %v1394_v13, %v128_v47  ;;  %v161_v17 = vmul.f32 %v1394_v13, %v129_v48  ;;  %v162_v18 = vmul.f32 %v1394_v13, %v130_v49 }
  0x8e   :  { %v163_v20 = vmul.f32 %v1394_v13, %v131_v50  ;;  %v164_v25 = vmul.f32 %v1394_v13, %v132_v54  ;;  %v165_v26 = vmul.f32 %v1394_v13, %v133_v57  ;;  %v166_v33 = vmul.f32 %v1394_v13, %v134_v60  ;;  %v740_v13 = vld [vmem:[#allocation8 + $0x58] sm:$0xff] }
  0x8f   :  { %v174_v21 = vmul.f32 %v1020_v14, %v159_v15  ;;  %v175_v22 = vmul.f32 %v1020_v14, %v160_v16  ;;  %v176_v23 = vmul.f32 %v1020_v14, %v161_v17  ;;  %v177_v24 = vmul.f32 %v1020_v14, %v162_v18  ;;  %v738_v15 = vld [vmem:[#allocation8 + $0x48] sm:$0xff]  ;;  %v737_v16 = vld [vmem:[#allocation8 + $0x40] sm:$0xff]  ;;  %v736_v17 = vld [vmem:[#allocation8 + $0x38] sm:$0xff] }
  0x90   :  { %v178_v30 = vmul.f32 %v1020_v14, %v163_v20  ;;  %v179_v32 = vmul.f32 %v1020_v14, %v164_v25  ;;  %v180_v35 = vmul.f32 %v1020_v14, %v165_v26  ;;  %v181_v37 = vmul.f32 %v1020_v14, %v166_v33  ;;  %v739_v14 = vld [vmem:[#allocation8 + $0x50] sm:$0xff]  ;;  %v733_v20 = vld [vmem:[#allocation8 + $0x20] sm:$0xff]  ;;  %v880_v33 = vld [vmem:[#allocation10 + $0x78] sm:$0xff] }
  0x91   :  { %v189_v27 = vadd.f32 %v1021_v19, %v174_v21  ;;  %v190_v28 = vadd.f32 %v1021_v19, %v175_v22  ;;  %v191_v29 = vadd.f32 %v1021_v19, %v176_v23  ;;  %v192_v31 = vadd.f32 %v1021_v19, %v177_v24  ;;  %v735_v18 = vld [vmem:[#allocation8 + $0x30] sm:$0xff]  ;;  %v732_v21 = vld [vmem:[#allocation8 + $0x18] sm:$0xff] }
  0x92   :  { %v193_v34 = vadd.f32 %v1021_v19, %v178_v30  ;;  %v194_v36 = vadd.f32 %v1021_v19, %v179_v32  ;;  %v195_v38 = vadd.f32 %v1021_v19, %v180_v35  ;;  %v196_v39 = vadd.f32 %v1021_v19, %v181_v37  ;;  %v734_v19 = vld [vmem:[#allocation8 + $0x28] sm:$0xff]  ;;  %v731_v22 = vld [vmem:[#allocation8 + $0x10] sm:$0xff]  ;;  %v729_v32 = vld [vmem:[#allocation8] sm:$0xff] }
  0x93   :  { %1201 = vmatprep.mubr.f32.mxu0 %v189_v27  ;;  %v878_v35 = vld [vmem:[#allocation10 + $0x68] sm:$0xff]  ;;  %v876_v37 = vld [vmem:[#allocation10 + $0x58] sm:$0xff] }
  0x94   :  { %1202 = vmatmul.mubr.f32.vlgmr.msra.gmra.mxu0 %v190_v28 }
  0x95   :  { %1204 = vmatprep.mubr.f32.mxu0 %v191_v29 }
  0x98   :  { %1205 = vmatmul.mubr.f32.gmra.mxu0 %v192_v31  ;;  %v730_v31 = vld [vmem:[#allocation8 + $0x8] sm:$0xff] }
  0x99   :  { %1207 = vmatprep.mubr.f32.mxu0 %v193_v34  ;;  %v879_v34 = vld [vmem:[#allocation10 + $0x70] sm:$0xff] }
  0x9c   :  { %1208 = vmatmul.mubr.f32.gmra.mxu0 %v194_v36  ;;  %v877_v36 = vld [vmem:[#allocation10 + $0x60] sm:$0xff] }
  0x9d   :  { %1210 = vmatprep.mubr.f32.mxu0 %v195_v38  ;;  %v875_v38 = vld [vmem:[#allocation10 + $0x50] sm:$0xff] }
  0xa0   :  { %1211 = vmatmul.mubr.f32.gmra.mxu0 %v196_v39 }
 0x10d   :  { %v1231_v40 = vpop.f32.mrf.mxu1 }
 0x10f   :  { %v432_v41 = vpop.f32.mrf.mxu1 }
 0x110   :  { %1257 = vmatprep.mubr.msk.f32.mxu1 %vm341_vm0, %v432_v41 }
 0x111   :  { %v1234_v42 = vpop.f32.mrf.mxu1 }
 0x113   :  { %v442_v43 = vpop.f32.mrf.mxu1 }
 0x115   :  { %v1237_v44 = vpop.f32.mrf.mxu1 }
 0x117   :  { %v452_v45 = vpop.f32.mrf.mxu1 }
 0x119   :  { %v1240_v46 = vpop.f32.mrf.mxu1 }
 0x11a   :  { %1241 = vmatprep.subr.mxu1 %v1240_v46 }
 0x11b   :  { %v462_v47 = vpop.f32.mrf.mxu1  ;;  %1242 = vmatpush3.msra.mxu1 %v1240_v46 }
 0x11c   :  { %1243 = vmatprep.subr.mxu1 %v462_v47 }
 0x11d   :  { %1244 = vmatpush3.msra.mxu1 %v462_v47 }
 0x11e   :  { %1245 = vmatprep.subr.mxu1 %v1237_v44 }
 0x11f   :  { %1246 = vmatpush3.msra.mxu1 %v1237_v44 }
 0x120   :  { %1247 = vmatprep.subr.mxu1 %v452_v45 }
 0x121   :  { %1248 = vmatpush3.msra.mxu1 %v452_v45 }
 0x122   :  { %1249 = vmatprep.subr.mxu1 %v1234_v42 }
 0x123   :  { %1250 = vmatpush3.msra.mxu1 %v1234_v42 }
 0x124   :  { %1251 = vmatprep.subr.mxu1 %v442_v43 }
 0x125   :  { %1252 = vmatpush3.msra.mxu1 %v442_v43 }
 0x126   :  { %1253 = vmatprep.subr.mxu1 %v1231_v40 }
 0x127   :  { %1254 = vmatpush3.msra.mxu1 %v1231_v40 }
 0x128   :  { %1255 = vmatprep.subr.mxu1 %v432_v41 }
 0x129   :  { %1256 = vmatpush3.msra.mxu1 %v432_v41 }
 0x12a   :  { %1258 = vmatmul.mubr.msk.f32.vlgmr.msra.gmra.mxu1 %vm341_vm0, %v1231_v40  ;;  %1297 = vmatprep.subr.mxu1 %v744_v6 }
 0x12b   :  { %1260 = vmatprep.mubr.msk.f32.mxu1 %vm341_vm0, %v442_v43  ;;  %1298 = vmatpush3.msra.mxu1 %v744_v6 }
 0x12c   :  { %1299 = vmatprep.subr.mxu1 %v743_v7 }
 0x12d   :  { %1300 = vmatpush3.msra.mxu1 %v743_v7 }
 0x12e   :  { %1261 = vmatmul.mubr.msk.f32.gmra.mxu1 %vm341_vm0, %v1234_v42  ;;  %1301 = vmatprep.subr.mxu1 %v742_v9 }
 0x12f   :  { %1263 = vmatprep.mubr.msk.f32.mxu1 %vm341_vm0, %v452_v45  ;;  %1302 = vmatpush3.msra.mxu1 %v742_v9 }
 0x130   :  { %1303 = vmatprep.subr.mxu1 %v741_v11 }
 0x131   :  { %1304 = vmatpush3.msra.mxu1 %v741_v11 }
 0x132   :  { %1264 = vmatmul.mubr.msk.f32.gmra.mxu1 %vm341_vm0, %v1237_v44  ;;  %1305 = vmatprep.subr.mxu1 %v740_v13 }
 0x133   :  { %1266 = vmatprep.mubr.msk.f32.mxu1 %vm341_vm0, %v462_v47  ;;  %1306 = vmatpush3.msra.mxu1 %v740_v13  ;;  %v874_v47 = vld [vmem:[#allocation10 + $0x48] sm:$0xff] }
 0x134   :  { %1307 = vmatprep.subr.mxu1 %v739_v14 }
 0x135   :  { %1308 = vmatpush3.msra.mxu1 %v739_v14 }
 0x136   :  { %1267 = vmatmul.mubr.msk.f32.gmra.mxu1 %vm341_vm0, %v1240_v46  ;;  %1309 = vmatprep.subr.mxu1 %v738_v15 }
 0x137   :  { %1310 = vmatpush3.msra.mxu1 %v738_v15 }
 0x138   :  { %1311 = vmatprep.subr.mxu1 %v737_v16 }
 0x139   :  { %1312 = vmatpush3.msra.mxu1 %v737_v16 }
 0x13a   :  { %1313 = vmatprep.subr.mxu1 %v736_v17 }
 0x13b   :  { %1314 = vmatpush3.msra.mxu1 %v736_v17 }
 0x13c   :  { %1315 = vmatprep.subr.mxu1 %v735_v18 }
 0x13d   :  { %1316 = vmatpush3.msra.mxu1 %v735_v18  ;;  %v1048_v18 = vld [vmem:[%s1737_s9] ss:$0 sm:$0xff]  ;;  %s1006_s9 = sshll.u32 %s1562_s23, 4  ;;  %s1007_s9 = int_to_ptr.vmem [resolvable:$true] %s1006_s9 }
 0x13e   :  { %1317 = vmatprep.subr.mxu1 %v734_v19  ;;  %s1527_s24 = scalar_lea.vmem %s1007_s9, 1024  ;;  %p1532_p12 = scmp.lt.s32.totalorder %s1007_s9, %s1007_s9 }
 0x13f   :  { %1318 = vmatpush3.msra.mxu1 %v734_v19  ;;  %p1528_p11 = scmp.ne.s32.totalorder %s1007_s9, %s1527_s24  ;;  %p1533_p13 = scmp.lt.s32.totalorder %s1527_s24, %s1527_s24 }
 0x140   :  { %1319 = vmatprep.subr.mxu1 %v733_v20 }
 0x141   :  { %1320 = vmatpush3.msra.mxu1 %v733_v20  ;;  %p1534_p0 = por %p1533_p13, %p1532_p12 }
 0x142   :  { %1321 = vmatprep.subr.mxu1 %v732_v21 }
 0x143   :  { %1322 = vmatpush3.msra.mxu1 %v732_v21  ;;  %p1535_p1 = pnand %p1534_p0, %p1528_p11 }
 0x144   :  { %1323 = vmatprep.subr.mxu1 %v731_v22 }
 0x145   :  { %1324 = vmatpush3.msra.mxu1 %v731_v22 }
 0x146   :  { %1325 = vmatprep.subr.mxu1 %v730_v31 }
 0x147   :  { %1326 = vmatpush3.msra.mxu1 %v730_v31 }
 0x148   :  { %1327 = vmatprep.subr.mxu1 %v729_v32 }
 0x149   :  { %1328 = vmatpush3.msra.mxu1 %v729_v32 }
 0x154   :  { %v1203_v48 = vpop.f32.mrf.mxu0 }
 0x155   :  { %v292_v63 = vadd.f32 %v1203_v48, %v1022_v53  ;;  %v873_v48 = vld [vmem:[#allocation10 + $0x40] sm:$0xff] }
 0x156   :  { %v286_v49 = vpop.f32.mrf.mxu0 }
 0x157   :  { %v287_v0 = vadd.f32 %v1022_v53, %v286_v49  ;;  %v872_v49 = vld [vmem:[#allocation10 + $0x38] sm:$0xff] }
 0x158   :  { %v1206_v50 = vpop.f32.mrf.mxu0 }
 0x159   :  { %v302_v61 = vadd.f32 %v1206_v50, %v1022_v53  ;;  %v871_v50 = vld [vmem:[#allocation10 + $0x30] sm:$0xff] }
 0x15a   :  { %v296_v51 = vpop.f32.mrf.mxu0 }
 0x15b   :  { %v297_v62 = vadd.f32 %v1022_v53, %v296_v51  ;;  %v870_v51 = vld [vmem:[#allocation10 + $0x28] sm:$0xff] }
 0x15c   :  { %v1209_v52 = vpop.f32.mrf.mxu0 }
 0x15d   :  { %v312_v55 = vadd.f32 %v1209_v52, %v1022_v53  ;;  %v869_v52 = vld [vmem:[#allocation10 + $0x20] sm:$0xff] }
 0x15e   :  { %v306_v54 = vpop.f32.mrf.mxu0 }
 0x15f   :  { %v307_v59 = vadd.f32 %v1022_v53, %v306_v54  ;;  %v867_v54 = vld [vmem:[#allocation10 + $0x10] sm:$0xff] }
 0x160   :  { %v1212_v56 = vpop.f32.mrf.mxu0 }
 0x161   :  { %v322_v57 = vadd.f32 %v1212_v56, %v1022_v53  ;;  %v865_v56 = vld [vmem:[#allocation10] sm:$0xff] }
 0x162   :  { %v316_v58 = vpop.f32.mrf.mxu0 }
 0x163   :  { %1395 = vtanh.f32 %v322_v57  ;;  %v317_v60 = vadd.f32 %v1022_v53, %v316_v58  ;;  %v868_v53 = vld [vmem:[#allocation10 + $0x18] sm:$0xff]  ;;  %v1047_v57 = vld [vmem:[%s1735_s7] ss:$0 sm:$0xff] }
 0x164   :  { %1397 = vtanh.f32 %v312_v55  ;;  %v866_v55 = vld [vmem:[#allocation10 + $0x8] sm:$0xff] }
 0x165   :  { %1399 = vtanh.f32 %v317_v60 }
 0x166   :  { %1401 = vtanh.f32 %v307_v59 }
 0x167   :  { %1403 = vtanh.f32 %v302_v61 }
 0x168   :  { %1405 = vtanh.f32 %v297_v62 }
 0x169   :  { %1407 = vtanh.f32 %v292_v63 }
 0x16a   :  { %1409 = vtanh.f32 %v287_v0 }
 0x170   :  { %v1396_v1 = vpop.eup %1395 }
 0x171   :  { %v1398_v2 = vpop.eup %1397  ;;  %1269 = vmatprep.subr.mxu0 %v1396_v1 }
 0x172   :  { %v1400_v3 = vpop.eup %1399  ;;  %1270 = vmatpush3.msra.mxu0 %v1396_v1 }
 0x173   :  { %1271 = vmatprep.subr.mxu0 %v1400_v3  ;;  %v1402_v4 = vpop.eup %1401 }
 0x174   :  { %1272 = vmatpush3.msra.mxu0 %v1400_v3  ;;  %v1404_v5 = vpop.eup %1403 }
 0x175   :  { %1273 = vmatprep.subr.mxu0 %v1398_v2  ;;  %v1406_v8 = vpop.eup %1405 }
 0x176   :  { %1274 = vmatpush3.msra.mxu0 %v1398_v2  ;;  %v1408_v10 = vpop.eup %1407 }
 0x177   :  { %1275 = vmatprep.subr.mxu0 %v1402_v4  ;;  %v1410_v12 = vpop.eup %1409 }
 0x178   :  { %1276 = vmatpush3.msra.mxu0 %v1402_v4 }
 0x179   :  { %1277 = vmatprep.subr.mxu0 %v1404_v5 }
 0x17a   :  { %1278 = vmatpush3.msra.mxu0 %v1404_v5 }
 0x17b   :  { %1279 = vmatprep.subr.mxu0 %v1406_v8 }
 0x17c   :  { %1280 = vmatpush3.msra.mxu0 %v1406_v8 }
 0x17d   :  { %1281 = vmatprep.subr.mxu0 %v1408_v10 }
 0x17e   :  { %1282 = vmatpush3.msra.mxu0 %v1408_v10 }
 0x17f   :  { %1283 = vmatprep.subr.mxu0 %v1410_v12 }
 0x180   :  { %1284 = vmatpush3.msra.mxu0 %v1410_v12 }
 0x181   :  { %1341 = vmatprep.subr.mxu0 %v880_v33 }
 0x1ea   :  { %v1259_v23 = vpop.f32.mrf.mxu1 }
 0x1ec   :  { %v561_v24 = vpop.f32.mrf.mxu1 }
 0x1ed   :  { %1285 = vmatprep.mubr.msk.f32.mxu0 %vm341_vm0, %v561_v24 }
 0x1ee   :  { %v1262_v25 = vpop.f32.mrf.mxu1  ;;  %1286 = vmatmul.mubr.msk.f32.vlgmr.msra.gmra.mxu0 %vm341_vm0, %v1259_v23 }
 0x1ef   :  { %1342 = vmatpush3.msra.mxu0 %v880_v33 }
 0x1f0   :  { %v571_v26 = vpop.f32.mrf.mxu1  ;;  %1343 = vmatprep.subr.mxu0 %v879_v34 }
 0x1f1   :  { %1288 = vmatprep.mubr.msk.f32.mxu0 %vm341_vm0, %v571_v26  ;;  %1344 = vmatpush3.msra.mxu0 %v879_v34 }
 0x1f2   :  { %v1265_v27 = vpop.f32.mrf.mxu1  ;;  %1289 = vmatmul.mubr.msk.f32.gmra.mxu0 %vm341_vm0, %v1262_v25  ;;  %1345 = vmatprep.subr.mxu0 %v878_v35 }
 0x1f3   :  { %1346 = vmatpush3.msra.mxu0 %v878_v35 }
 0x1f4   :  { %v581_v28 = vpop.f32.mrf.mxu1  ;;  %1347 = vmatprep.subr.mxu0 %v877_v36 }
 0x1f5   :  { %1291 = vmatprep.mubr.msk.f32.mxu0 %vm341_vm0, %v581_v28  ;;  %1348 = vmatpush3.msra.mxu0 %v877_v36 }
 0x1f6   :  { %v1268_v29 = vpop.f32.mrf.mxu1  ;;  %1292 = vmatmul.mubr.msk.f32.gmra.mxu0 %vm341_vm0, %v1265_v27  ;;  %1349 = vmatprep.subr.mxu0 %v876_v37 }
 0x1f7   :  { %1350 = vmatpush3.msra.mxu0 %v876_v37 }
 0x1f8   :  { %v591_v30 = vpop.f32.mrf.mxu1  ;;  %1351 = vmatprep.subr.mxu0 %v875_v38 }
 0x1f9   :  { %1294 = vmatprep.mubr.msk.f32.mxu0 %vm341_vm0, %v591_v30  ;;  %1352 = vmatpush3.msra.mxu0 %v875_v38 }
 0x1fa   :  { %1295 = vmatmul.mubr.msk.f32.gmra.mxu0 %vm341_vm0, %v1268_v29  ;;  %1353 = vmatprep.subr.mxu0 %v874_v47 }
 0x1fb   :  { %1354 = vmatpush3.msra.mxu0 %v874_v47 }
 0x1fc   :  { %1355 = vmatprep.subr.mxu0 %v873_v48 }
 0x1fd   :  { %1356 = vmatpush3.msra.mxu0 %v873_v48 }
 0x1fe   :  { %1357 = vmatprep.subr.mxu0 %v872_v49 }
 0x1ff   :  { %1358 = vmatpush3.msra.mxu0 %v872_v49 }
 0x200   :  { %1359 = vmatprep.subr.mxu0 %v871_v50 }
 0x201   :  { %1360 = vmatpush3.msra.mxu0 %v871_v50 }
 0x202   :  { %1361 = vmatprep.subr.mxu0 %v870_v51 }
 0x203   :  { %1362 = vmatpush3.msra.mxu0 %v870_v51 }
 0x204   :  { %1363 = vmatprep.subr.mxu0 %v869_v52 }
 0x205   :  { %1364 = vmatpush3.msra.mxu0 %v869_v52 }
 0x206   :  { %1365 = vmatprep.subr.mxu0 %v868_v53 }
 0x207   :  { %1366 = vmatpush3.msra.mxu0 %v868_v53 }
 0x208   :  { %1367 = vmatprep.subr.mxu0 %v867_v54 }
 0x209   :  { %1368 = vmatpush3.msra.mxu0 %v867_v54 }
 0x20a   :  { %1369 = vmatprep.subr.mxu0 %v866_v55 }
 0x20b   :  { %1370 = vmatpush3.msra.mxu0 %v866_v55 }
 0x20c   :  { %1371 = vmatprep.subr.mxu0 %v865_v56 }
 0x20d   :  { %1372 = vmatpush3.msra.mxu0 %v865_v56 }
 0x2ae   :  { %v1287_v39 = vpop.f32.mrf.mxu0 }
 0x2b0   :  { %v690_v40 = vpop.f32.mrf.mxu0 }
 0x2b1   :  { %1329 = vmatprep.mubr.f32.mxu1 %v690_v40 }
 0x2b2   :  { %v1290_v41 = vpop.f32.mrf.mxu0  ;;  %1330 = vmatmul.mubr.f32.vlgmr.msra.gmra.mxu1 %v1287_v39 }
 0x2b4   :  { %v700_v42 = vpop.f32.mrf.mxu0 }
 0x2b5   :  { %1332 = vmatprep.mubr.f32.mxu1 %v700_v42 }
 0x2b6   :  { %v1293_v43 = vpop.f32.mrf.mxu0  ;;  %1333 = vmatmul.mubr.f32.gmra.mxu1 %v1290_v41 }
 0x2b8   :  { %v710_v44 = vpop.f32.mrf.mxu0 }
 0x2b9   :  { %1335 = vmatprep.mubr.f32.mxu1 %v710_v44 }
 0x2ba   :  { %v1296_v45 = vpop.f32.mrf.mxu0  ;;  %1336 = vmatmul.mubr.f32.gmra.mxu1 %v1293_v43 }
 0x2bc   :  { %v720_v46 = vpop.f32.mrf.mxu0 }
 0x2bd   :  { %1338 = vmatprep.mubr.f32.mxu1 %v720_v46 }
 0x2be   :  { %1339 = vmatmul.mubr.f32.gmra.mxu1 %v1296_v45 }
 0x372   :  { %v1331_v58 = vpop.f32.mrf.mxu1 }
 0x373   :  { %v824_v59 = vadd.f32 %v1331_v58, %v1047_v57 }
 0x374   :  { %v818_v60 = vpop.f32.mrf.mxu1 }
 0x375   :  { %v819_v61 = vadd.f32 %v1047_v57, %v818_v60 }
 0x376   :  { %v1334_v62 = vpop.f32.mrf.mxu1 }
 0x377   :  { %1411 = vtanh.f32 %v819_v61  ;;  %v834_v63 = vadd.f32 %v1334_v62, %v1047_v57 }
 0x378   :  { %1413 = vtanh.f32 %v824_v59  ;;  %v828_v0 = vpop.f32.mrf.mxu1 }
 0x379   :  { %v829_v1 = vadd.f32 %v1047_v57, %v828_v0 }
 0x37a   :  { %v1337_v2 = vpop.f32.mrf.mxu1 }
 0x37b   :  { %1415 = vtanh.f32 %v829_v1  ;;  %v844_v3 = vadd.f32 %v1337_v2, %v1047_v57 }
 0x37c   :  { %1417 = vtanh.f32 %v834_v63  ;;  %v838_v4 = vpop.f32.mrf.mxu1 }
 0x37d   :  { %v839_v5 = vadd.f32 %v1047_v57, %v838_v4 }
 0x37e   :  { %v1340_v6 = vpop.f32.mrf.mxu1 }
 0x37f   :  { %1419 = vtanh.f32 %v839_v5  ;;  %v854_v7 = vadd.f32 %v1340_v6, %v1047_v57 }
 0x380   :  { %1421 = vtanh.f32 %v844_v3  ;;  %v848_v8 = vpop.f32.mrf.mxu1 }
 0x381   :  { %v849_v9 = vadd.f32 %v1047_v57, %v848_v8 }
 0x383   :  { %1423 = vtanh.f32 %v849_v9 }
 0x384   :  { %v1412_v10 = vpop.eup %1411  ;;  %1425 = vtanh.f32 %v854_v7 }
 0x385   :  { %v1414_v11 = vpop.eup %1413  ;;  %1373 = vmatprep.mubr.f32.mxu0 %v1412_v10 }
 0x386   :  { %1374 = vmatmul.mubr.f32.vlgmr.msra.gmra.mxu0 %v1414_v11 }
 0x388   :  { %v1416_v12 = vpop.eup %1415 }
 0x389   :  { %v1418_v13 = vpop.eup %1417  ;;  %1376 = vmatprep.mubr.f32.mxu0 %v1416_v12 }
 0x38a   :  { %1377 = vmatmul.mubr.f32.gmra.mxu0 %v1418_v13 }
 0x38c   :  { %v1420_v14 = vpop.eup %1419 }
 0x38d   :  { %v1422_v15 = vpop.eup %1421  ;;  %1379 = vmatprep.mubr.f32.mxu0 %v1420_v14 }
 0x38e   :  { %1380 = vmatmul.mubr.f32.gmra.mxu0 %v1422_v15 }
 0x390   :  { %v1424_v16 = vpop.eup %1423 }
 0x391   :  { %v1426_v17 = vpop.eup %1425  ;;  %1382 = vmatprep.mubr.f32.mxu0 %v1424_v16 }
 0x392   :  { %1383 = vmatmul.mubr.f32.gmra.mxu0 %v1426_v17 }
 0x446   :  { %v1375_v19 = vpop.f32.mrf.mxu0 }
 0x447   :  { %v960_v20 = vadd.f32 %v1375_v19, %v1048_v18 }
 0x448   :  { %v954_v21 = vpop.f32.mrf.mxu0 }
 0x449   :  { %994 = vst [vmem:[#allocation11 + $0x8] sm:$0xff] %v960_v20  ;;  %v955_v22 = vadd.f32 %v1048_v18, %v954_v21 }
 0x44a   :  { %v1378_v23 = vpop.f32.mrf.mxu0 }
 0x44b   :  { %993 = vst [vmem:[#allocation11] sm:$0xff] %v955_v22  ;;  %v970_v24 = vadd.f32 %v1378_v23, %v1048_v18 }
 0x44c   :  { %v964_v25 = vpop.f32.mrf.mxu0 }
 0x44d   :  { %996 = vst [vmem:[#allocation11 + $0x18] sm:$0xff] %v970_v24  ;;  %v965_v26 = vadd.f32 %v1048_v18, %v964_v25 }
 0x44e   :  { %v1381_v27 = vpop.f32.mrf.mxu0 }
 0x44f   :  { %995 = vst [vmem:[#allocation11 + $0x10] sm:$0xff] %v965_v26  ;;  %v980_v28 = vadd.f32 %v1381_v27, %v1048_v18 }
 0x450   :  { %v974_v29 = vpop.f32.mrf.mxu0 }
 0x451   :  { %998 = vst [vmem:[#allocation11 + $0x28] sm:$0xff] %v980_v28  ;;  %v975_v30 = vadd.f32 %v1048_v18, %v974_v29 }
 0x452   :  { %v1384_v31 = vpop.f32.mrf.mxu0 }
 0x453   :  { %997 = vst [vmem:[#allocation11 + $0x20] sm:$0xff] %v975_v30  ;;  %v990_v32 = vadd.f32 %v1384_v31, %v1048_v18 }
 0x454   :  { %v984_v33 = vpop.f32.mrf.mxu0 }
 0x455   :  { %1000 = vst [vmem:[#allocation11 + $0x38] sm:$0xff] %v990_v32  ;;  %v985_v34 = vadd.f32 %v1048_v18, %v984_v33 }
 0x457   :  { %999 = vst [vmem:[#allocation11 + $0x30] sm:$0xff] %v985_v34 }
 0x458   :  { %1538 = shalt.err (!%p1535_p1)
}
 0x459   :  { %1012 = dma.vmem_to_hbm [thread:$0]  %s1007_s9, 1024, %s1738_s10, [#allocation4], %s1557_s18, %s1557_s18, %s1558_s19  }
 0x45a   :  { %1553 = dma.done.wait [#allocation4], 1024  }
 0x45b   :  { %1554 = vsyncadd [#allocation4], 4294966272 }
 0x45c   :  { %1016 = vsyncpa [#allocation3], 1 }
 0x45d   :  { %1017 = vsyncpa [#allocation6], 1 }
 0x45e   :  { %1018 = vsyncpa [#allocation9], 1 }
 0x45f   :  { %1019 = vsyncpa [#allocation4], 1 }

</bundles_post_ra>
